<compile_context>
chip_gen: v5e
topology: v5e:2x2
jax: 0.10.0
libtpu: 0.0.40
codegen_flags: <defaults>
</compile_context>

<pallas_src>
import functools
import math

import jax
import jax.numpy as jnp
from jax import lax
from jax.experimental import pallas as pl
from jax.experimental.pallas import tpu as pltpu


def _round_up(x, m):
    return (x + m - 1) // m * m


def _angular_penalty_kernel(xn_ref, w_ref, lab_ref, out_ref,
                            max_ref, sum_ref, tgt_ref, *,
                            loss_type, s, m, eps, c_tile, n_pad_classes):
    k = pl.program_id(1)
    nk = pl.num_programs(1)

    # --- first C tile of this row block: reset the per-row accumulators.
    @pl.when(k == 0)
    def _init():
        max_ref[...] = jnp.full_like(max_ref, -1e30)
        sum_ref[...] = jnp.zeros_like(sum_ref)
        tgt_ref[...] = jnp.zeros_like(tgt_ref)

    # --- s * cosine logits for this (N tile, C tile).  s is pre-folded into xn and W
    #     is already (d, c), so this is a plain MXU matmul (bf16 in, f32 accumulate):
    #     no per-tile transpose, no (tn, tc) post-scale.
    logits = lax.dot_general(xn_ref[...], w_ref[...],
                             dimension_numbers=(((1,), (0,)), ((), ())),
                             preferred_element_type=jnp.float32)        # (tn, tc)

    # --- local column iota vs. tile-shifted labels (no global (tn, tc) index add).
    local_col = lax.broadcasted_iota(jnp.int32, logits.shape, 1)
    is_target = local_col == (lab_ref[...] - k * c_tile)                # (tn, tc)

    # --- accumulate the target's s*cos (the labelled class lives in exactly one tile).
    tgt_ref[...] += jnp.sum(jnp.where(is_target, logits, 0.0), axis=1, keepdims=True)

    # --- streaming log-sum-exp over the NON-target classes.  The target column is
    #     excluded here (like the reference's one-hot exclusion), so finalize never
    #     has to subtract a potentially-dominant term (no cancellation).
    m_prev = max_ref[...]
    m_new = jnp.maximum(m_prev, jnp.max(logits, axis=1, keepdims=True))
    e = jnp.where(is_target, 0.0, jnp.exp(logits - m_new))
    sum_ref[...] = (jnp.exp(m_prev - m_new) * sum_ref[...]
                    + jnp.sum(e, axis=1, keepdims=True))
    max_ref[...] = m_new

    # --- last C tile: remove padded-class contribution, apply the angular penalty.
    @pl.when(k == nk - 1)
    def _finalize():
        big_m = max_ref[...]
        excl = sum_ref[...]
        if n_pad_classes:
            # Padded class columns (zero W columns) have logits exactly 0, so their
            # total contribution to the streamed sum is n_pad_classes * exp(-big_m).
            excl = jnp.maximum(excl - n_pad_classes * jnp.exp(-big_m), 0.0)

        t = tgt_ref[...] * (1.0 / s)                                    # target cosine
        if loss_type == "cosface":
            numerator = s * (t - m)
        elif loss_type == "arcface":
            tcl = jnp.clip(t, -1.0 + eps, 1.0 - eps)
            # cos(acos(t) + m) == t*cos(m) - sqrt(1 - t^2)*sin(m)   (exact identity)
            numerator = s * (tcl * math.cos(m) - jnp.sqrt(1.0 - tcl * tcl) * math.sin(m))
        else:  # sphereface
            # TODO(synk): relies on jnp.arccos lowering in Mosaic; only a (tn,1) op.
            tcl = jnp.clip(t, -1.0 + eps, 1.0 - eps)
            numerator = s * jnp.cos(m * jnp.arccos(tcl))

        big = jnp.maximum(big_m, numerator)                             # stable shift
        denom = jnp.exp(numerator - big) + excl * jnp.exp(big_m - big)
        # L_i = numerator - log(exp(numerator) + sum_{j != y} exp(s * wf_j))
        out_ref[...] = numerator - (big + jnp.log(denom))


def _select_tiles(n, c, d_pad, row_tile, class_tile):
    """Generation-aware tile caps + VMEM limit (v7x has 64 MiB/TC, v5e/v6e 128 MiB)."""
    try:
        vmem_cap = int(pltpu.get_tpu_info().vmem_capacity_bytes)
    except Exception:
        vmem_cap = 128 << 20
    if vmem_cap <= (64 << 20):        # v7x-class TensorCore
        tn_cap, tc_cap = 512, 1024
    else:                             # v5e / v6e
        tn_cap, tc_cap = 1024, 2048
    vmem_limit = min(int(vmem_cap * 0.75), 112 << 20)

    if row_tile is not None:
        tn_cap = row_tile
    if class_tile is not None:
        tc_cap = class_tile

    tn = min(tn_cap, _round_up(n, 8))
    tc = min(tc_cap, _round_up(c, 128))

    def est(tn_, tc_):
        return (2 * tn_ * d_pad * 2          # xn tile, double-buffered (bf16)
                + 2 * d_pad * tc_ * 2        # W tile, double-buffered (bf16)
                + 2 * tn_ * 4 + 2 * tn_ * 4  # labels / out, double-buffered
                + 3 * tn_ * 4                # per-row accumulators
                + 2 * tn_ * tc_ * 4)         # (tn, tc) f32 logits/exp temporaries

    while est(tn, tc) > int(0.8 * vmem_limit) and tn > 64:
        tn = max(64, tn // 2)
    while est(tn, tc) > int(0.8 * vmem_limit) and tc > 256:
        tc = max(256, tc // 2)
    return tn, tc, vmem_limit


def angular_penalty_sm_loss(x, weight, labels, *, loss_type="arcface",
                            s=None, m=None, eps=1e-7,
                            mxu_dtype=jnp.bfloat16,
                            row_tile=None, class_tile=None):
    loss_type = loss_type.lower()
    assert loss_type in ("arcface", "sphereface", "cosface")
    if loss_type == "arcface":
        s = 64.0 if s is None else s
        m = 0.5 if m is None else m
    elif loss_type == "sphereface":
        s = 64.0 if s is None else s
        m = 1.35 if m is None else m
    else:  # cosface
        s = 30.0 if s is None else s
        m = 0.4 if m is None else m
    s = float(s)
    m = float(m)

    n, d = x.shape
    c, d_w = weight.shape
    assert d == d_w

    # labels: (N, C) scores (argmax, like the PyTorch module) or an (N,) index vector.
    if labels.ndim == 2:
        label_idx = jnp.argmax(labels, axis=1)
    else:
        label_idx = labels
    label_idx = label_idx.astype(jnp.int32)

    # --- lane/sublane-friendly padding (features & classes map to lanes) and tiles.
    d_pad = _round_up(max(d, 128), 128)
    tn, tc, vmem_limit = _select_tiles(n, c, d_pad, row_tile, class_tile)
    n_pad = _round_up(n, tn)
    c_pad = _round_up(c, tc)
    n_pad_classes = c_pad - c

    # --- wrapper-side prep: L2-normalize x, fold s, cast bf16; pad + transpose W.
    xf = x.astype(jnp.float32)
    # F.normalize(x, p=2, dim=1): x / max(||x||, 1e-12) == x * rsqrt(max(||x||^2, 1e-24))
    inv_norm = lax.rsqrt(jnp.maximum(jnp.sum(xf * xf, axis=1, keepdims=True), 1e-24))
    xn = (xf * (inv_norm * s)).astype(mxu_dtype)                       # (n, d) bf16, = s * x_hat
    xn_p = jnp.pad(xn, ((0, n_pad - n), (0, d_pad - d)))

    w_p = jnp.pad(weight, ((0, c_pad - c), (0, d_pad - d))).astype(mxu_dtype).T  # (d_pad, c_pad)
    lab_p = jnp.pad(label_idx, (0, n_pad - n)).reshape(n_pad, 1)

    grid = (n_pad // tn, c_pad // tc)

    kernel = functools.partial(
        _angular_penalty_kernel, loss_type=loss_type, s=s, m=m, eps=float(eps),
        c_tile=tc, n_pad_classes=n_pad_classes)

    per_row = pl.pallas_call(
        kernel,
        out_shape=jax.ShapeDtypeStruct((n_pad, 1), jnp.float32),
        grid_spec=pltpu.PrefetchScalarGridSpec(
            num_scalar_prefetch=0,
            grid=grid,
            in_specs=[
                pl.BlockSpec((tn, d_pad), lambda i, k: (i, 0)),   # s * x_hat   (bf16)
                pl.BlockSpec((d_pad, tc), lambda i, k: (0, k)),   # W^T         (bf16)
                pl.BlockSpec((tn, 1), lambda i, k: (i, 0)),       # labels      (int32)
            ],
            out_specs=pl.BlockSpec((tn, 1), lambda i, k: (i, 0)),
            scratch_shapes=[
                pltpu.VMEM((tn, 1), jnp.float32),     # running row max of s*wf
                pltpu.VMEM((tn, 1), jnp.float32),     # running sum of exp (non-target)
                pltpu.VMEM((tn, 1), jnp.float32),     # target s*cos
            ]),
        compiler_params=pltpu.CompilerParams(
            dimension_semantics=("parallel", "arbitrary"),
            vmem_limit_bytes=vmem_limit),
        cost_estimate=pl.CostEstimate(
            flops=2 * n_pad * d_pad * c_pad,
            transcendentals=n_pad * c_pad,
            bytes_accessed=(xn_p.size * 2
                            + grid[0] * c_pad * d_pad * 2
                            + lab_p.size * 4 + n_pad * 4)),
    )(xn_p, w_p, lab_p)

    # -mean over the real (unpadded) rows.
    return -jnp.mean(per_row[:n, 0])


def _reference(x, weight, labels, *, loss_type="arcface", s=64.0, m=0.5, eps=1e-7,
               mxu_dtype=jnp.bfloat16):
    """Pure-JAX mirror of the PyTorch forward (same bf16 matmul feed as the kernel)."""
    lab = jnp.argmax(labels, axis=1)
    xf = x.astype(jnp.float32)
    xn = xf * lax.rsqrt(jnp.maximum(jnp.sum(xf * xf, axis=1, keepdims=True), 1e-24))
    swf = lax.dot_general((xn * s).astype(mxu_dtype), weight.astype(mxu_dtype),
                          dimension_numbers=(((1,), (1,)), ((), ())),
                          preferred_element_type=jnp.float32)           # s * wf
    target = swf[jnp.arange(x.shape[0]), lab] / s
    tcl = jnp.clip(target, -1.0 + eps, 1.0 - eps)
    if loss_type == "cosface":
        num = s * (target - m)
    elif loss_type == "arcface":
        num = s * jnp.cos(jnp.arccos(tcl) + m)
    else:  # sphereface
        num = s * jnp.cos(m * jnp.arccos(tcl))
    onehot = jax.nn.one_hot(lab, weight.shape[0], dtype=bool)
    excl = jnp.sum(jnp.where(onehot, 0.0, jnp.exp(swf)), axis=1)
    L = num - jnp.log(jnp.exp(num) + excl)
    return -jnp.mean(L)


if __name__ == "__main__":
    N, IN_FEATURES, OUT_FEATURES = 8, 32, 16

    key = jax.random.PRNGKey(0)
    kx, kw, kl = jax.random.split(key, 3)

    # x['logits'] : (N, in_features)
    x = jax.random.normal(kx, (N, IN_FEATURES), dtype=jnp.float32)
    # nn.Linear(in, out, bias=False) weight: U(-1/sqrt(in), 1/sqrt(in)), shape (out, in)
    bound = 1.0 / math.sqrt(IN_FEATURES)
    weight = jax.random.uniform(kw, (OUT_FEATURES, IN_FEATURES),
                                minval=-bound, maxval=bound, dtype=jnp.float32)
    # labels : (N, out_features) scores; argmax(dim=1) gives the class index
    labels = jax.random.normal(kl, (N, OUT_FEATURES), dtype=jnp.float32)

    loss = angular_penalty_sm_loss(x, weight, labels, loss_type="arcface")
    loss = jax.block_until_ready(loss)

    ref = _reference(x, weight, labels, loss_type="arcface")
    assert jnp.allclose(loss, ref, rtol=2e-3, atol=2e-3), (loss, ref)

    print("KERNEL_OK")
</pallas_src>

<mosaic_0001>
module attributes {stable_mosaic.version = 11 : i64} {
  func.func @_angular_penalty_kernel(%arg0: i32, %arg1: i32, %arg2: memref<8x128xbf16, #tpu.memory_space<vmem>>, %arg3: memref<128x128xbf16, #tpu.memory_space<vmem>>, %arg4: memref<8x1xi32, #tpu.memory_space<vmem>>, %arg5: memref<8x1xf32, #tpu.memory_space<vmem>>, %arg6: memref<8x1xf32, #tpu.memory_space<vmem>>, %arg7: memref<8x1xf32, #tpu.memory_space<vmem>>, %arg8: memref<8x1xf32, #tpu.memory_space<vmem>>) attributes {dimension_semantics = [#tpu.dimension_semantics<parallel>, #tpu.dimension_semantics<arbitrary>], iteration_bounds = array<i64: 1, 1>, scalar_prefetch = 0 : i64, scratch_operands = 3 : i64, tpu.core_type = #tpu.core_type<tc>, window_params = [{transform_indices = @transform_0, window_bounds = array<i64: 8, 128>}, {transform_indices = @transform_1, window_bounds = array<i64: 128, 128>}, {transform_indices = @transform_2, window_bounds = array<i64: 8, 1>}, {transform_indices = @transform_3, window_bounds = array<i64: 8, 1>}]} {
    %c0_i32 = arith.constant 0 : i32
    %0 = arith.cmpi eq, %arg1, %c0_i32 : i32
    %1 = arith.extui %0 : i1 to i32
    %c0_i32_0 = arith.constant 0 : i32
    %2 = arith.cmpi ne, %1, %c0_i32_0 : i32
    scf.if %2 {
      %cst_25 = arith.constant -1.000000e+30 : f32
      %41 = vector.broadcast %cst_25 : f32 to vector<8x1xf32>
      %c0_26 = arith.constant 0 : index
      %c0_27 = arith.constant 0 : index
      %42 = vector.load %arg6[%c0_26, %c0_27] : memref<8x1xf32, #tpu.memory_space<vmem>>, vector<8x1xf32>
      tpu.vector_store %arg6[%c0_26, %c0_27], %41 {strides = array<i32>} : memref<8x1xf32, #tpu.memory_space<vmem>>, vector<8x1xf32>,
      %cst_28 = arith.constant 0.000000e+00 : f32
      %43 = vector.broadcast %cst_28 : f32 to vector<8x1xf32>
      %c0_29 = arith.constant 0 : index
      %c0_30 = arith.constant 0 : index
      %44 = vector.load %arg7[%c0_29, %c0_30] : memref<8x1xf32, #tpu.memory_space<vmem>>, vector<8x1xf32>
      tpu.vector_store %arg7[%c0_29, %c0_30], %43 {strides = array<i32>} : memref<8x1xf32, #tpu.memory_space<vmem>>, vector<8x1xf32>,
      %cst_31 = arith.constant 0.000000e+00 : f32
      %45 = vector.broadcast %cst_31 : f32 to vector<8x1xf32>
      %c0_32 = arith.constant 0 : index
      %c0_33 = arith.constant 0 : index
      %46 = vector.load %arg8[%c0_32, %c0_33] : memref<8x1xf32, #tpu.memory_space<vmem>>, vector<8x1xf32>
      tpu.vector_store %arg8[%c0_32, %c0_33], %45 {strides = array<i32>} : memref<8x1xf32, #tpu.memory_space<vmem>>, vector<8x1xf32>,
    } else {
    }
    %c0 = arith.constant 0 : index
    %c0_1 = arith.constant 0 : index
    %3 = vector.load %arg2[%c0, %c0_1] : memref<8x128xbf16, #tpu.memory_space<vmem>>, vector<8x128xbf16>
    %c0_2 = arith.constant 0 : index
    %c0_3 = arith.constant 0 : index
    %4 = vector.load %arg3[%c0_2, %c0_3] : memref<128x128xbf16, #tpu.memory_space<vmem>>, vector<128x128xbf16>
    %cst = arith.constant dense<0.000000e+00> : vector<8x128xf32>
    %5 = tpu.matmul %3, %4, %cst {dimension_numbers = #tpu.dot_dimension_numbers<[1], [0], [0], [1], [0, 0, 1, 1], [], []>} : vector<8x128xbf16>, vector<128x128xbf16>, vector<8x128xf32> -> vector<8x128xf32>
    %6 = tpu.iota {dimensions = array<i32: 1>} : vector<8x128xi32>
    %c0_4 = arith.constant 0 : index
    %c0_5 = arith.constant 0 : index
    %7 = vector.load %arg4[%c0_4, %c0_5] : memref<8x1xi32, #tpu.memory_space<vmem>>, vector<8x1xi32>
    %c128_i32 = arith.constant 128 : i32
    %8 = arith.muli %arg1, %c128_i32 : i32
    %9 = vector.broadcast %8 : i32 to vector<8x1xi32>
    %10 = arith.subi %7, %9 : vector<8x1xi32>
    %11 = vector.broadcast %10 : vector<8x1xi32> to vector<8x128xi32>
    %12 = arith.cmpi eq, %6, %11 : vector<8x128xi32>
    %c0_6 = arith.constant 0 : index
    %c0_7 = arith.constant 0 : index
    %13 = vector.load %arg8[%c0_6, %c0_7] : memref<8x1xf32, #tpu.memory_space<vmem>>, vector<8x1xf32>
    %cst_8 = arith.constant 0.000000e+00 : f32
    %14 = vector.broadcast %cst_8 : f32 to vector<8x128xf32>
    %15 = arith.select %12, %5, %14 : vector<8x128xi1>, vector<8x128xf32>
    %cst_9 = arith.constant dense<0.000000e+00> : vector<8xf32>
    %16 = vector.multi_reduction <add>, %15, %cst_9 [1] : vector<8x128xf32> to vector<8xf32>
    %17 = vector.shape_cast %16 : vector<8xf32> to vector<8x1xf32>
    %18 = arith.addf %13, %17 : vector<8x1xf32>
    %c0_10 = arith.constant 0 : index
    %c0_11 = arith.constant 0 : index
    %19 = vector.load %arg8[%c0_10, %c0_11] : memref<8x1xf32, #tpu.memory_space<vmem>>, vector<8x1xf32>
    tpu.vector_store %arg8[%c0_10, %c0_11], %18 {strides = array<i32>} : memref<8x1xf32, #tpu.memory_space<vmem>>, vector<8x1xf32>,
    %c0_12 = arith.constant 0 : index
    %c0_13 = arith.constant 0 : index
    %20 = vector.load %arg6[%c0_12, %c0_13] : memref<8x1xf32, #tpu.memory_space<vmem>>, vector<8x1xf32>
    %cst_14 = arith.constant dense<0xFF800000> : vector<8xf32>
    %21 = vector.multi_reduction <maximumf>, %5, %cst_14 [1] : vector<8x128xf32> to vector<8xf32>
    %22 = vector.shape_cast %21 : vector<8xf32> to vector<8x1xf32>
    %23 = arith.maximumf %20, %22 : vector<8x1xf32>
    %24 = vector.broadcast %23 : vector<8x1xf32> to vector<8x128xf32>
    %25 = arith.subf %5, %24 : vector<8x128xf32>
    %26 = math.exp %25 : vector<8x128xf32>
    %cst_15 = arith.constant 0.000000e+00 : f32
    %27 = vector.broadcast %cst_15 : f32 to vector<8x128xf32>
    %28 = arith.select %12, %27, %26 : vector<8x128xi1>, vector<8x128xf32>
    %29 = arith.subf %20, %23 : vector<8x1xf32>
    %30 = math.exp %29 : vector<8x1xf32>
    %c0_16 = arith.constant 0 : index
    %c0_17 = arith.constant 0 : index
    %31 = vector.load %arg7[%c0_16, %c0_17] : memref<8x1xf32, #tpu.memory_space<vmem>>, vector<8x1xf32>
    %32 = arith.mulf %30, %31 : vector<8x1xf32>
    %cst_18 = arith.constant dense<0.000000e+00> : vector<8xf32>
    %33 = vector.multi_reduction <add>, %28, %cst_18 [1] : vector<8x128xf32> to vector<8xf32>
    %34 = vector.shape_cast %33 : vector<8xf32> to vector<8x1xf32>
    %35 = arith.addf %32, %34 : vector<8x1xf32>
    %c0_19 = arith.constant 0 : index
    %c0_20 = arith.constant 0 : index
    %36 = vector.load %arg7[%c0_19, %c0_20] : memref<8x1xf32, #tpu.memory_space<vmem>>, vector<8x1xf32>
    tpu.vector_store %arg7[%c0_19, %c0_20], %35 {strides = array<i32>} : memref<8x1xf32, #tpu.memory_space<vmem>>, vector<8x1xf32>,
    %c0_21 = arith.constant 0 : index
    %c0_22 = arith.constant 0 : index
    %37 = vector.load %arg6[%c0_21, %c0_22] : memref<8x1xf32, #tpu.memory_space<vmem>>, vector<8x1xf32>
    tpu.vector_store %arg6[%c0_21, %c0_22], %23 {strides = array<i32>} : memref<8x1xf32, #tpu.memory_space<vmem>>, vector<8x1xf32>,
    %c0_i32_23 = arith.constant 0 : i32
    %38 = arith.cmpi eq, %arg1, %c0_i32_23 : i32
    %39 = arith.extui %38 : i1 to i32
    %c0_i32_24 = arith.constant 0 : i32
    %40 = arith.cmpi ne, %39, %c0_i32_24 : i32
    scf.if %40 {
      %c0_25 = arith.constant 0 : index
      %c0_26 = arith.constant 0 : index
      %41 = vector.load %arg6[%c0_25, %c0_26] : memref<8x1xf32, #tpu.memory_space<vmem>>, vector<8x1xf32>
      %c0_27 = arith.constant 0 : index
      %c0_28 = arith.constant 0 : index
      %42 = vector.load %arg7[%c0_27, %c0_28] : memref<8x1xf32, #tpu.memory_space<vmem>>, vector<8x1xf32>
      %cst_29 = arith.constant 0.000000e+00 : f32
      %43 = vector.broadcast %cst_29 : f32 to vector<8x1xf32>
      %44 = arith.subf %43, %41 : vector<8x1xf32>
      %45 = math.exp %44 : vector<8x1xf32>
      %cst_30 = arith.constant 1.120000e+02 : f32
      %46 = vector.broadcast %cst_30 : f32 to vector<8x1xf32>
      %47 = arith.mulf %46, %45 : vector<8x1xf32>
      %48 = arith.subf %42, %47 : vector<8x1xf32>
      %cst_31 = arith.constant 0.000000e+00 : f32
      %49 = vector.broadcast %cst_31 : f32 to vector<8x1xf32>
      %50 = arith.maximumf %48, %49 : vector<8x1xf32>
      %c0_32 = arith.constant 0 : index
      %c0_33 = arith.constant 0 : index
      %51 = vector.load %arg8[%c0_32, %c0_33] : memref<8x1xf32, #tpu.memory_space<vmem>>, vector<8x1xf32>
      %cst_34 = arith.constant 1.562500e-02 : f32
      %52 = vector.broadcast %cst_34 : f32 to vector<8x1xf32>
      %53 = arith.mulf %51, %52 : vector<8x1xf32>
      %cst_35 = arith.constant -0.99999988 : f32
      %cst_36 = arith.constant 0.99999988 : f32
      %54 = vector.broadcast %cst_35 : f32 to vector<8x1xf32>
      %55 = arith.maximumf %54, %53 : vector<8x1xf32>
      %56 = vector.broadcast %cst_36 : f32 to vector<8x1xf32>
      %57 = arith.minimumf %56, %55 : vector<8x1xf32>
      %cst_37 = arith.constant 0.87758255 : f32
      %58 = vector.broadcast %cst_37 : f32 to vector<8x1xf32>
      %59 = arith.mulf %57, %58 : vector<8x1xf32>
      %60 = arith.mulf %57, %57 : vector<8x1xf32>
      %cst_38 = arith.constant 1.000000e+00 : f32
      %61 = vector.broadcast %cst_38 : f32 to vector<8x1xf32>
      %62 = arith.subf %61, %60 : vector<8x1xf32>
      %63 = math.sqrt %62 : vector<8x1xf32>
      %cst_39 = arith.constant 0.47942555 : f32
      %64 = vector.broadcast %cst_39 : f32 to vector<8x1xf32>
      %65 = arith.mulf %63, %64 : vector<8x1xf32>
      %66 = arith.subf %59, %65 : vector<8x1xf32>
      %cst_40 = arith.constant 6.400000e+01 : f32
      %67 = vector.broadcast %cst_40 : f32 to vector<8x1xf32>
      %68 = arith.mulf %67, %66 : vector<8x1xf32>
      %69 = arith.maximumf %41, %68 : vector<8x1xf32>
      %70 = arith.subf %68, %69 : vector<8x1xf32>
      %71 = math.exp %70 : vector<8x1xf32>
      %72 = arith.subf %41, %69 : vector<8x1xf32>
      %73 = math.exp %72 : vector<8x1xf32>
      %74 = arith.mulf %50, %73 : vector<8x1xf32>
      %75 = arith.addf %71, %74 : vector<8x1xf32>
      %76 = math.log %75 : vector<8x1xf32>
      %77 = arith.addf %69, %76 : vector<8x1xf32>
      %78 = arith.subf %68, %77 : vector<8x1xf32>
      %c0_41 = arith.constant 0 : index
      %c0_42 = arith.constant 0 : index
      %79 = vector.load %arg5[%c0_41, %c0_42] : memref<8x1xf32, #tpu.memory_space<vmem>>, vector<8x1xf32>
      tpu.vector_store %arg5[%c0_41, %c0_42], %78 {strides = array<i32>} : memref<8x1xf32, #tpu.memory_space<vmem>>, vector<8x1xf32>,
    } else {
    }
    return
  }
  func.func @transform_0(%arg0: i32, %arg1: i32) -> (i32, i32) {
    %c0_i32 = arith.constant 0 : i32
    %c0_i32_0 = arith.constant 0 : i32
    return %arg0, %c0_i32 : i32, i32
  }
  func.func @transform_1(%arg0: i32, %arg1: i32) -> (i32, i32) {
    %c0_i32 = arith.constant 0 : i32
    %c0_i32_0 = arith.constant 0 : i32
    return %c0_i32, %arg1 : i32, i32
  }
  func.func @transform_2(%arg0: i32, %arg1: i32) -> (i32, i32) {
    %c0_i32 = arith.constant 0 : i32
    %c0_i32_0 = arith.constant 0 : i32
    return %arg0, %c0_i32 : i32, i32
  }
  func.func @transform_3(%arg0: i32, %arg1: i32) -> (i32, i32) {
    %c0_i32 = arith.constant 0 : i32
    %c0_i32_0 = arith.constant 0 : i32
    return %arg0, %c0_i32 : i32, i32
  }
}

</mosaic_0001>

<bundles_post_ra>
// kernel: tpu_custom_call.1
= control target key start
LH: loop header
LB: loop body
LE: loop exit
PB: predicated region body
PF: predicated region fallthrough
CT: control target
= control target key end

     0   :  { %8 = vsyncpa [#allocation6], 0  ;;  %s297_s15 = smov [#allocation5]   ;;  %s298_s17 = smov 64   ;;  %s342_s0 = inlined_call_operand.vmem [shape: bf16[8,128], index: 0, kind: input, shape index: {}]   ;;  %s343_s1 = inlined_call_operand.hbm [shape: bf16[128,128], index: 1, kind: input, shape index: {}]   ;;  %s344_s2 = inlined_call_operand.vmem [shape: s32[8,1], index: 2, kind: input, shape index: {}]   ;;  %s345_s3 = inlined_call_operand.vmem [shape: f32[8,1], index: 3, kind: output, shape index: {}]  }
   0x1   :  { %s15_s14 = sshll.u32 %s343_s1, 4  ;;  %s17_s16 = sshll.u32 %s297_s15, 4  ;;  %s16_s14 = int_to_ptr.hbm [resolvable:$true] %s15_s14  ;;  %s18_s16 = int_to_ptr.vmem [resolvable:$true] %s17_s16 }
   0x2   :  { %s299_s18 = smov 4  }
   0x3   :  { %23 = dma.hbm_to_vmem [thread:$0]  %s16_s14, 1024, %s18_s16, [#allocation6], %s298_s17, %s298_s17, %s299_s18  }
   0x4   :  { %295 = dma.done.wait [#allocation6], 1024  }
   0x5   :  { %296 = vsyncadd [#allocation6], 4294966272  ;;  %v248_v0 = vld [vmem:[#allocation5 + $0x38] sm:$0xff]  ;;  %v247_v1 = vld [vmem:[#allocation5 + $0x30] sm:$0xff]  ;;  %v300_v9 = vmov 0   ;;  %vm34_vm0 = vcmask 7168   ;;  %v116_v19 = vlaneseq }
   0x6   :  { %103 = vmatpush.bf16.msra.mxu0 %v248_v0  ;;  %v246_v2 = vld [vmem:[#allocation5 + $0x28] sm:$0xff]  ;;  %v245_v3 = vld [vmem:[#allocation5 + $0x20] sm:$0xff]  ;;  %v244_v4 = vld [vmem:[#allocation5 + $0x18] sm:$0xff]  ;;  %255 = vset.pattern.permute.xlu0 %v300_v9  ;;  %v301_v10 = vmov -1e+30   ;;  %v302_v14 = vmov 0.0  }
   0x7   :  { %v243_v5 = vld [vmem:[#allocation5 + $0x10] sm:$0xff]  ;;  %v242_v6 = vld [vmem:[#allocation5 + $0x8] sm:$0xff]  ;;  %v241_v7 = vld [vmem:[#allocation5] sm:$0xff]  ;;  %256 = vset.pattern.permute.xlu1 %v300_v9  ;;  %35 = vst.msk [vmem:[#allocation2] sm:$0xff] %vm34_vm0, %v301_v10  ;;  %v117_v20 = vand.u32 127, %v116_v19 }
   0x8   :  { %v38_v8 = vld [vmem:[%s342_s0] sm:$0xf]  ;;  %37 = vst.msk [vmem:[#allocation4] sm:$0xff] %vm34_vm0, %v302_v14 }
   0x9   :  { %v118_v13 = vld [vmem:[%s344_s2] sm:$0xff]  ;;  %36 = vst.msk [vmem:[#allocation3] sm:$0xff] %vm34_vm0, %v302_v14 }
   0xa   :  { %104 = vmatpush.bf16.msra.mxu0 %v247_v1 }
   0xe   :  { %105 = vmatpush.bf16.msra.mxu0 %v246_v2  ;;  %v133_v15 = vld [vmem:[#allocation2] sm:$0xff] }
   0xf   :  { %v126_v28 = vld [vmem:[#allocation4] sm:$0xff] }
  0x10   :  { %v149_v56 = vld [vmem:[#allocation3] sm:$0xff] }
  0x12   :  { %106 = vmatpush.bf16.msra.mxu0 %v245_v3 }
  0x16   :  { %107 = vmatpush.bf16.msra.mxu0 %v244_v4 }
  0x1a   :  { %108 = vmatpush.bf16.msra.mxu0 %v243_v5 }
  0x1e   :  { %109 = vmatpush.bf16.msra.mxu0 %v242_v6 }
  0x22   :  { %110 = vmatpush.bf16.msra.mxu0 %v241_v7 }
  0x25   :  { %111 = vmatmul.bf16.vlgmr.msra.gmra.mxu0 %v38_v8 }
  0xa2   :  { %v112_v11 = vpop.f32.mrf.mxu0 }
  0xa3   :  { %134 = vmax.xlane.f32.xlu0 %v112_v11 }
  0xaa   :  { %v114_v12 = vpop.f32.mrf.mxu0 }
  0xb7   :  { %123 = vperm.xlu0 %255, %v118_v13  }
 0x116   :  { %v135_v16 = vpop.xlane.xlu0 %134 }
 0x117   :  { %v136_v17 = vmax.f32 %v133_v15, %v135_v16 }
 0x119   :  { %v146_v18 = vsub.f32 %v133_v15, %v136_v17  ;;  %155 = vst.msk [vmem:[#allocation2] sm:$0xff] %vm34_vm0, %v136_v17  ;;  %139 = vperm.xlu1 %256, %v136_v17  }
 0x11b   :  { %v147_v47 = vmul.f32 1.442695, %v146_v18 }
 0x120   :  { %v159_v50 = vld [vmem:[#allocation2] sm:$0xff] }
 0x121   :  { %v161_v51 = vsub.f32 0.0, %v159_v50 }
 0x123   :  { %v162_v54 = vmul.f32 1.442695, %v161_v51 }
 0x129   :  { %v124_v21 = vpop.permute.xlu0 %123 }
 0x12a   :  { %vm125_vm1 = vcmp.eq.s32.totalorder %v117_v20, %v124_v21 }
 0x12b   :  { %v127_v22 = vsel %vm125_vm1, %v112_v11, 0.0 }
 0x143   :  { %128 = vadd.xlane.f32.xlu1 %v127_v22 }
 0x18b   :  { %v140_v23 = vpop.permute.xlu1 %139 }
 0x18c   :  { %v142_v24 = vsub.f32 %v112_v11, %v140_v23 }
 0x18e   :  { %v143_v25 = vmul.f32 1.442695, %v142_v24 }
 0x190   :  { %257 = vpow2.f32 %v143_v25 }
 0x196   :  { %v258_v26 = vpop.eup %257 }
 0x197   :  { %v145_v27 = vsel %vm125_vm1, 0.0, %v258_v26 }
 0x198   :  { %151 = vadd.xlane.f32.xlu2 %v145_v27 }
 0x1b6   :  { %v129_v29 = vpop.xlane.xlu1 %128 }
 0x1b7   :  { %v130_v30 = vadd.f32 %v129_v29, %v126_v28 }
 0x1b9   :  { %132 = vst.msk [vmem:[#allocation4] sm:$0xff] %vm34_vm0, %v130_v30 }
 0x1c0   :  { %v167_v31 = vld [vmem:[#allocation4] sm:$0xff] }
 0x1c1   :  { %v168_v32 = vmul.f32 0.015625, %v167_v31 }
 0x1c3   :  { %v240_v33 = vclamps-f32 %v168_v32, 0.9999999 }
 0x1c5   :  { %v172_v34 = vmul.f32 %v240_v33, %v240_v33  ;;  %v171_v48 = vmul.f32 0.87758255, %v240_v33 }
 0x1c7   :  { %v173_v35 = vsub.f32 1.0, %v172_v34 }
 0x1c9   :  { %259 = vrsqrt.f32 %v173_v35  ;;  %vm181_vm2 = vcmp.eq.f32.partialorder %v173_v35, inf  ;;  %v184_v44 = vand.u32 2147483648, %v173_v35  ;;  %vm183_vm3 = vcmp.eq.f32.partialorder %v173_v35, 0.0 }
 0x1ca   :  { %261 = vpow2.f32 %v147_v47 }
 0x1cb   :  { %263 = vpow2.f32 %v162_v54 }
 0x1cf   :  { %v260_v36 = vpop.eup %259 }
 0x1d0   :  { %v175_v37 = vmul.f32 %v260_v36, %v173_v35  ;;  %v262_v53 = vpop.eup %261 }
 0x1d1   :  { %v150_v57 = vmul.f32 %v262_v53, %v149_v56  ;;  %v264_v63 = vpop.eup %263 }
 0x1d2   :  { %v176_v38 = vmul.f32 %v260_v36, %v175_v37  ;;  %v164_v1 = vmul.f32 112.0, %v264_v63 }
 0x1d4   :  { %v177_v39 = vmul.f32 0.5, %v176_v38 }
 0x1d6   :  { %v178_v40 = vsub.f32 1.5, %v177_v39 }
 0x1d8   :  { %v179_v41 = vmul.f32 %v260_v36, %v178_v40 }
 0x1da   :  { %v180_v42 = vmul.f32 %v179_v41, %v173_v35 }
 0x1dc   :  { %v182_v43 = vsel %vm181_vm2, %v173_v35, %v180_v42 }
 0x1dd   :  { %v185_v45 = vsel %vm183_vm3, %v184_v44, %v182_v43 }
 0x1de   :  { %v186_v46 = vmul.f32 0.47942555, %v185_v45 }
 0x1e0   :  { %v187_v49 = vsub.f32 %v171_v48, %v186_v46 }
 0x1e2   :  { %v188_v52 = vmul.f32 64.0, %v187_v49 }
 0x1e4   :  { %v189_v55 = vmax.f32 %v159_v50, %v188_v52 }
 0x1e6   :  { %v193_v59 = vsub.f32 %v159_v50, %v189_v55  ;;  %v190_v61 = vsub.f32 %v188_v52, %v189_v55 }
 0x1e8   :  { %v194_v62 = vmul.f32 1.442695, %v193_v59  ;;  %v191_v0 = vmul.f32 1.442695, %v190_v61 }
 0x1ea   :  { %265 = vpow2.f32 %v194_v62 }
 0x1eb   :  { %267 = vpow2.f32 %v191_v0 }
 0x1f0   :  { %v266_v5 = vpop.eup %265 }
 0x1f1   :  { %v268_v7 = vpop.eup %267 }
 0x20b   :  { %v152_v58 = vpop.xlane.xlu2 %151 }
 0x20c   :  { %v153_v60 = vadd.f32 %v152_v58, %v150_v57 }
 0x20e   :  { %154 = vst.msk [vmem:[#allocation3] sm:$0xff] %vm34_vm0, %v153_v60 }
 0x215   :  { %v160_v2 = vld [vmem:[#allocation3] sm:$0xff] }
 0x216   :  { %v165_v3 = vsub.f32 %v160_v2, %v164_v1 }
 0x218   :  { %v166_v4 = vmax.f32 %v165_v3, 0.0 }
 0x21a   :  { %v196_v6 = vmul.f32 %v266_v5, %v166_v4 }
 0x21c   :  { %v197_v8 = vadd.f32 %v268_v7, %v196_v6 }
 0x21e   :  { %269 = vlog2.f32 %v197_v8 }
 0x224   :  { %v270_v9 = vpop.eup %269 }
 0x225   :  { %v199_v10 = vmul.f32 0.6931472, %v270_v9 }
 0x227   :  { %v200_v11 = vadd.f32 %v199_v10, %v189_v55 }
 0x229   :  { %v201_v12 = vsub.f32 %v188_v52, %v200_v11 }
 0x22b   :  { %202 = vst.msk [vmem:[%s345_s3] sm:$0xff] %vm34_vm0, %v201_v12 }
 0x22c   :  { %207 = vsyncpa [#allocation6], 1 }

</bundles_post_ra>
